<compile_context>
chip_gen: v5e
topology: v5e:2x2
jax: 0.10.0
libtpu: 0.0.40
codegen_flags: <defaults>
</compile_context>

<pallas_src>
import functools

import jax
import jax.numpy as jnp
from jax import lax
from jax.experimental import pallas as pl
from jax.experimental.pallas import tpu as pltpu

HIDDEN = 50          # true hidden width of the PyTorch module
OUT = 3              # true number of classes
HIDDEN_PAD = 128     # lane-aligned hidden / logit width (zero padding)
NEG_LARGE = -1e30    # mask value for padded logit columns inside the kernel


def mlp_kernel(x_ref, w1_ref, b1_ref, w2_ref, b2_ref, w3_ref, b3_ref, o_ref):
    x = x_ref[...]
    # layer1 + ReLU  (padded hidden columns are exactly 0: zero weights/bias)
    h1 = jnp.dot(x, w1_ref[...], preferred_element_type=jnp.float32) + b1_ref[...]
    h1 = jnp.maximum(h1, 0.0)
    # layer2 + ReLU
    h2 = jnp.dot(h1, w2_ref[...], preferred_element_type=jnp.float32) + b2_ref[...]
    h2 = jnp.maximum(h2, 0.0)
    # layer3 logits on the padded 128-lane width, then masked softmax over the
    # first OUT columns only (exact division -> rows sum to 1 in f32).
    logits = jnp.dot(h2, w3_ref[...], preferred_element_type=jnp.float32) + b3_ref[...]
    col = lax.broadcasted_iota(jnp.int32, logits.shape, 1)
    valid = col < OUT
    logits = jnp.where(valid, logits, NEG_LARGE)
    m = jnp.max(logits, axis=-1, keepdims=True)
    e = jnp.where(valid, jnp.exp(logits - m), 0.0)
    denom = jnp.sum(e, axis=-1, keepdims=True)
    probs = e / denom                       # exact reciprocal: kernel is mem-bound
    # narrow (tile_b, 3) store: 12 B/row of output HBM traffic instead of 512 B/row
    o_ref[...] = probs[:, :OUT].astype(o_ref.dtype)


def _round_up(v, m):
    return (v + m - 1) // m * m


@functools.partial(jax.jit, static_argnames=("tile_b",))
def mlp_forward(x, w1, b1, w2, b2, w3, b3, *, tile_b=4096):
    batch, input_dim = x.shape
    # Batch tile: multiple of 8 sublanes, no larger than the (padded) batch.
    # At tile_b=4096, input_dim=32: ~1 MiB double-buffered x + ~6 MiB of f32
    # intermediates -> comfortably under the 32 MiB scoped VMEM default
    # (and under v7x's smaller physical VMEM).
    tile_b = min(tile_b, _round_up(batch, 8))
    b_pad = _round_up(batch, tile_b)
    if b_pad != batch:
        x = jnp.pad(x, ((0, b_pad - batch), (0, 0)))

    grid = (b_pad // tile_b,)
    out = pl.pallas_call(
        mlp_kernel,
        out_shape=jax.ShapeDtypeStruct((b_pad, OUT), jnp.float32),
        grid=grid,
        in_specs=[
            # x: one batch tile per grid step (double-buffered by Pallas)
            pl.BlockSpec((tile_b, input_dim), lambda i: (i, 0)),
            # weights / biases: same block every step -> stay VMEM-resident
            pl.BlockSpec((input_dim, HIDDEN_PAD), lambda i: (0, 0)),
            pl.BlockSpec((1, HIDDEN_PAD), lambda i: (0, 0)),
            pl.BlockSpec((HIDDEN_PAD, HIDDEN_PAD), lambda i: (0, 0)),
            pl.BlockSpec((1, HIDDEN_PAD), lambda i: (0, 0)),
            pl.BlockSpec((HIDDEN_PAD, HIDDEN_PAD), lambda i: (0, 0)),
            pl.BlockSpec((1, HIDDEN_PAD), lambda i: (0, 0)),
        ],
        # direct (tile_b, OUT) output block: OUT == full last dim, so legal;
        # no post-kernel column-slice pass over a padded slab.
        out_specs=pl.BlockSpec((tile_b, OUT), lambda i: (i, 0)),
        compiler_params=pltpu.CompilerParams(
            dimension_semantics=("parallel",)),
    )(x, w1, b1, w2, b2, w3, b3)
    if b_pad != batch:
        out = out[:batch]          # drop padded batch rows only
    return out


def init_params(key, input_dim):
    # Deterministic synthetic init mimicking nn.Linear's
    # uniform(-1/sqrt(fan_in), 1/sqrt(fan_in)), stored pre-padded (once, at init).
    ks = jax.random.split(key, 6)

    def lin(kw, kb, fan_in, fan_out, fan_in_pad, fan_out_pad):
        bound = 1.0 / jnp.sqrt(jnp.float32(fan_in))
        w = jax.random.uniform(kw, (fan_in, fan_out), jnp.float32, -bound, bound)
        b = jax.random.uniform(kb, (1, fan_out), jnp.float32, -bound, bound)
        w = jnp.pad(w, ((0, fan_in_pad - fan_in), (0, fan_out_pad - fan_out)))
        b = jnp.pad(b, ((0, 0), (0, fan_out_pad - fan_out)))
        return w, b

    w1, b1 = lin(ks[0], ks[1], input_dim, HIDDEN, input_dim, HIDDEN_PAD)
    w2, b2 = lin(ks[2], ks[3], HIDDEN, HIDDEN, HIDDEN_PAD, HIDDEN_PAD)
    w3, b3 = lin(ks[4], ks[5], HIDDEN, OUT, HIDDEN_PAD, HIDDEN_PAD)
    return w1, b1, w2, b2, w3, b3


def reference_forward(x, w1, b1, w2, b2, w3, b3):
    # Pure-JAX reference on the *unpadded* sub-matrices (independent check that
    # the padding/masking reproduces the original 50/50/3 network exactly).
    w1u, b1u = w1[:, :HIDDEN], b1[:, :HIDDEN]
    w2u, b2u = w2[:HIDDEN, :HIDDEN], b2[:, :HIDDEN]
    w3u, b3u = w3[:HIDDEN, :OUT], b3[:, :OUT]
    h1 = jax.nn.relu(x @ w1u + b1u)
    h2 = jax.nn.relu(h1 @ w2u + b2u)
    return jax.nn.softmax(h2 @ w3u + b3u, axis=-1)


if __name__ == "__main__":
    key = jax.random.PRNGKey(0)
    kx, kp = jax.random.split(key)

    batch, input_dim = 8, 32
    x = jax.random.normal(kx, (batch, input_dim), jnp.float32)
    params = init_params(kp, input_dim)

    out = jax.block_until_ready(mlp_forward(x, *params))

    assert out.shape == (batch, OUT)
    # exact-division softmax: rows sum to 1 at f32 precision
    assert jnp.allclose(jnp.sum(out, axis=1), 1.0, atol=1e-4)
    # match the unpadded pure-JAX reference
    ref = reference_forward(x, *params)
    assert jnp.allclose(out, ref, atol=1e-4, rtol=1e-4)
    print("KERNEL_OK")
</pallas_src>

<mosaic_0001>
module attributes {stable_mosaic.version = 11 : i64} {
  func.func @mlp_kernel(%arg0: i32, %arg1: memref<8x32xf32, #tpu.memory_space<vmem>>, %arg2: memref<32x128xf32, #tpu.memory_space<vmem>>, %arg3: memref<1x128xf32, #tpu.memory_space<vmem>>, %arg4: memref<128x128xf32, #tpu.memory_space<vmem>>, %arg5: memref<1x128xf32, #tpu.memory_space<vmem>>, %arg6: memref<128x128xf32, #tpu.memory_space<vmem>>, %arg7: memref<1x128xf32, #tpu.memory_space<vmem>>, %arg8: memref<8x3xf32, #tpu.memory_space<vmem>>) attributes {dimension_semantics = [#tpu.dimension_semantics<parallel>], iteration_bounds = array<i64: 1>, scalar_prefetch = 0 : i64, scratch_operands = 0 : i64, tpu.core_type = #tpu.core_type<tc>, window_params = [{transform_indices = @transform_0, window_bounds = array<i64: 8, 32>}, {pipeline_mode = #tpu.pipeline_mode<synchronous>, transform_indices = @transform_1, window_bounds = array<i64: 32, 128>}, {pipeline_mode = #tpu.pipeline_mode<synchronous>, transform_indices = @transform_2, window_bounds = array<i64: 1, 128>}, {pipeline_mode = #tpu.pipeline_mode<synchronous>, transform_indices = @transform_3, window_bounds = array<i64: 128, 128>}, {pipeline_mode = #tpu.pipeline_mode<synchronous>, transform_indices = @transform_4, window_bounds = array<i64: 1, 128>}, {pipeline_mode = #tpu.pipeline_mode<synchronous>, transform_indices = @transform_5, window_bounds = array<i64: 128, 128>}, {pipeline_mode = #tpu.pipeline_mode<synchronous>, transform_indices = @transform_6, window_bounds = array<i64: 1, 128>}, {transform_indices = @transform_7, window_bounds = array<i64: 8, 3>}]} {
    %c0 = arith.constant 0 : index
    %c0_0 = arith.constant 0 : index
    %0 = vector.load %arg1[%c0, %c0_0] : memref<8x32xf32, #tpu.memory_space<vmem>>, vector<8x32xf32>
    %c0_1 = arith.constant 0 : index
    %c0_2 = arith.constant 0 : index
    %1 = vector.load %arg2[%c0_1, %c0_2] : memref<32x128xf32, #tpu.memory_space<vmem>>, vector<32x128xf32>
    %cst = arith.constant dense<0.000000e+00> : vector<8x128xf32>
    %2 = tpu.matmul %0, %1, %cst {dimension_numbers = #tpu.dot_dimension_numbers<[1], [0], [0], [1], [0, 0, 1, 1], [], []>} : vector<8x32xf32>, vector<32x128xf32>, vector<8x128xf32> -> vector<8x128xf32>
    %c0_3 = arith.constant 0 : index
    %c0_4 = arith.constant 0 : index
    %3 = vector.load %arg3[%c0_3, %c0_4] : memref<1x128xf32, #tpu.memory_space<vmem>>, vector<1x128xf32>
    %4 = vector.broadcast %3 : vector<1x128xf32> to vector<8x128xf32>
    %5 = arith.addf %2, %4 : vector<8x128xf32>
    %cst_5 = arith.constant 0.000000e+00 : f32
    %6 = vector.broadcast %cst_5 : f32 to vector<8x128xf32>
    %7 = arith.maximumf %5, %6 : vector<8x128xf32>
    %c0_6 = arith.constant 0 : index
    %c0_7 = arith.constant 0 : index
    %8 = vector.load %arg4[%c0_6, %c0_7] : memref<128x128xf32, #tpu.memory_space<vmem>>, vector<128x128xf32>
    %cst_8 = arith.constant dense<0.000000e+00> : vector<8x128xf32>
    %9 = tpu.matmul %7, %8, %cst_8 {dimension_numbers = #tpu.dot_dimension_numbers<[1], [0], [0], [1], [0, 0, 1, 1], [], []>} : vector<8x128xf32>, vector<128x128xf32>, vector<8x128xf32> -> vector<8x128xf32>
    %c0_9 = arith.constant 0 : index
    %c0_10 = arith.constant 0 : index
    %10 = vector.load %arg5[%c0_9, %c0_10] : memref<1x128xf32, #tpu.memory_space<vmem>>, vector<1x128xf32>
    %11 = vector.broadcast %10 : vector<1x128xf32> to vector<8x128xf32>
    %12 = arith.addf %9, %11 : vector<8x128xf32>
    %cst_11 = arith.constant 0.000000e+00 : f32
    %13 = vector.broadcast %cst_11 : f32 to vector<8x128xf32>
    %14 = arith.maximumf %12, %13 : vector<8x128xf32>
    %c0_12 = arith.constant 0 : index
    %c0_13 = arith.constant 0 : index
    %15 = vector.load %arg6[%c0_12, %c0_13] : memref<128x128xf32, #tpu.memory_space<vmem>>, vector<128x128xf32>
    %cst_14 = arith.constant dense<0.000000e+00> : vector<8x128xf32>
    %16 = tpu.matmul %14, %15, %cst_14 {dimension_numbers = #tpu.dot_dimension_numbers<[1], [0], [0], [1], [0, 0, 1, 1], [], []>} : vector<8x128xf32>, vector<128x128xf32>, vector<8x128xf32> -> vector<8x128xf32>
    %c0_15 = arith.constant 0 : index
    %c0_16 = arith.constant 0 : index
    %17 = vector.load %arg7[%c0_15, %c0_16] : memref<1x128xf32, #tpu.memory_space<vmem>>, vector<1x128xf32>
    %18 = vector.broadcast %17 : vector<1x128xf32> to vector<8x128xf32>
    %19 = arith.addf %16, %18 : vector<8x128xf32>
    %20 = tpu.iota {dimensions = array<i32: 1>} : vector<8x128xi32>
    %c3_i32 = arith.constant 3 : i32
    %21 = vector.broadcast %c3_i32 : i32 to vector<8x128xi32>
    %22 = arith.cmpi slt, %20, %21 : vector<8x128xi32>
    %cst_17 = arith.constant -1.000000e+30 : f32
    %23 = vector.broadcast %cst_17 : f32 to vector<8x128xf32>
    %24 = arith.select %22, %19, %23 : vector<8x128xi1>, vector<8x128xf32>
    %cst_18 = arith.constant dense<0xFF800000> : vector<8xf32>
    %25 = vector.multi_reduction <maximumf>, %24, %cst_18 [1] : vector<8x128xf32> to vector<8xf32>
    %26 = vector.shape_cast %25 : vector<8xf32> to vector<8x1xf32>
    %27 = vector.broadcast %26 : vector<8x1xf32> to vector<8x128xf32>
    %28 = arith.subf %24, %27 : vector<8x128xf32>
    %29 = math.exp %28 : vector<8x128xf32>
    %cst_19 = arith.constant 0.000000e+00 : f32
    %30 = vector.broadcast %cst_19 : f32 to vector<8x128xf32>
    %31 = arith.select %22, %29, %30 : vector<8x128xi1>, vector<8x128xf32>
    %cst_20 = arith.constant dense<0.000000e+00> : vector<8xf32>
    %32 = vector.multi_reduction <add>, %31, %cst_20 [1] : vector<8x128xf32> to vector<8xf32>
    %33 = vector.shape_cast %32 : vector<8xf32> to vector<8x1xf32>
    %34 = vector.broadcast %33 : vector<8x1xf32> to vector<8x128xf32>
    %35 = arith.divf %31, %34 : vector<8x128xf32>
    %36 = vector.extract_strided_slice %35 {offsets = [0, 0], sizes = [8, 3], strides = [1, 1]} : vector<8x128xf32> to vector<8x3xf32>
    %c0_21 = arith.constant 0 : index
    %c0_22 = arith.constant 0 : index
    %37 = vector.load %arg8[%c0_21, %c0_22] : memref<8x3xf32, #tpu.memory_space<vmem>>, vector<8x3xf32>
    tpu.vector_store %arg8[%c0_21, %c0_22], %36 {strides = array<i32>} : memref<8x3xf32, #tpu.memory_space<vmem>>, vector<8x3xf32>,
    return
  }
  func.func @transform_0(%arg0: i32) -> (i32, i32) {
    %c0_i32 = arith.constant 0 : i32
    %c0_i32_0 = arith.constant 0 : i32
    return %arg0, %c0_i32 : i32, i32
  }
  func.func @transform_1(%arg0: i32) -> (i32, i32) {
    %c0_i32 = arith.constant 0 : i32
    %c0_i32_0 = arith.constant 0 : i32
    %c0_i32_1 = arith.constant 0 : i32
    return %c0_i32, %c0_i32_0 : i32, i32
  }
  func.func @transform_2(%arg0: i32) -> (i32, i32) {
    %c0_i32 = arith.constant 0 : i32
    %c0_i32_0 = arith.constant 0 : i32
    %c0_i32_1 = arith.constant 0 : i32
    return %c0_i32, %c0_i32_0 : i32, i32
  }
  func.func @transform_3(%arg0: i32) -> (i32, i32) {
    %c0_i32 = arith.constant 0 : i32
    %c0_i32_0 = arith.constant 0 : i32
    %c0_i32_1 = arith.constant 0 : i32
    return %c0_i32, %c0_i32_0 : i32, i32
  }
  func.func @transform_4(%arg0: i32) -> (i32, i32) {
    %c0_i32 = arith.constant 0 : i32
    %c0_i32_0 = arith.constant 0 : i32
    %c0_i32_1 = arith.constant 0 : i32
    return %c0_i32, %c0_i32_0 : i32, i32
  }
  func.func @transform_5(%arg0: i32) -> (i32, i32) {
    %c0_i32 = arith.constant 0 : i32
    %c0_i32_0 = arith.constant 0 : i32
    %c0_i32_1 = arith.constant 0 : i32
    return %c0_i32, %c0_i32_0 : i32, i32
  }
  func.func @transform_6(%arg0: i32) -> (i32, i32) {
    %c0_i32 = arith.constant 0 : i32
    %c0_i32_0 = arith.constant 0 : i32
    %c0_i32_1 = arith.constant 0 : i32
    return %c0_i32, %c0_i32_0 : i32, i32
  }
  func.func @transform_7(%arg0: i32) -> (i32, i32) {
    %c0_i32 = arith.constant 0 : i32
    %c0_i32_0 = arith.constant 0 : i32
    return %arg0, %c0_i32 : i32, i32
  }
}

</mosaic_0001>

<bundles_post_ra>
// kernel: mlp_forward.1
= control target key start
LH: loop header
LB: loop body
LE: loop exit
PB: predicated region body
PF: predicated region fallthrough
CT: control target
= control target key end

     0   :  { %12 = vsyncpa [#allocation3], 0  ;;  %s424_s0 = inlined_call_operand.hbm [shape: f32[8,32], index: 0, kind: input, shape index: {}]   ;;  %s425_s1 = inlined_call_operand.hbm [shape: f32[32,128], index: 1, kind: input, shape index: {}]   ;;  %s426_s2 = inlined_call_operand.vmem [shape: f32[1,128], index: 2, kind: input, shape index: {}]   ;;  %s427_s3 = inlined_call_operand.hbm [shape: f32[128,128], index: 3, kind: input, shape index: {}]   ;;  %s428_s4 = inlined_call_operand.vmem [shape: f32[1,128], index: 4, kind: input, shape index: {}]   ;;  %s429_s5 = inlined_call_operand.hbm [shape: f32[128,128], index: 5, kind: input, shape index: {}]   ;;  %s430_s6 = inlined_call_operand.vmem [shape: f32[1,128], index: 6, kind: input, shape index: {}]   ;;  %s431_s7 = inlined_call_operand.vmem [shape: f32[8,3], index: 7, kind: output, shape index: {}]  }
   0x1   :  { %13 = vsyncpa [#allocation5], 0  ;;  %s30_s26 = sshll.u32 %s425_s1, 4  ;;  %s31_s26 = int_to_ptr.hbm [resolvable:$true] %s30_s26 }
   0x2   :  { %14 = vsyncpa [#allocation8], 0  ;;  %s354_s27 = smov [#allocation4]   ;;  %s20_s8 = sshll.u32 %s424_s0, 4  ;;  %s21_s8 = int_to_ptr.hbm [resolvable:$true] %s20_s8 }
   0x3   :  { %s32_s28 = sshll.u32 %s354_s27, 4  ;;  %s355_s9 = smov 128   ;;  %s33_s28 = int_to_ptr.vmem [resolvable:$true] %s32_s28 }
   0x4   :  { %s356_s10 = smov 8   ;;  %s357_s11 = smov [#allocation2]  }
   0x5   :  { %38 = dma.hbm_to_vmem [thread:$0]  %s31_s26, 512, %s33_s28, [#allocation5], %s355_s9, %s355_s9, %s356_s10  }
   0x6   :  { %s22_s12 = sshll.u32 %s357_s11, 4  ;;  %s45_s15 = sshll.u32 %s427_s3, 4  ;;  %s23_s12 = int_to_ptr.vmem [resolvable:$true] %s22_s12  ;;  %s46_s15 = int_to_ptr.hbm [resolvable:$true] %s45_s15 }
   0x7   :  { %25 = dma.hbm_to_vmem [thread:$0]  %s21_s8, 128, %s23_s12, [#allocation3]  }
   0x8   :  { %s60_s17 = sshll.u32 %s429_s5, 4  ;;  %s358_s18 = smov [#allocation6]   ;;  %s61_s17 = int_to_ptr.hbm [resolvable:$true] %s60_s17 }
   0x9   :  { %s47_s19 = sshll.u32 %s358_s18, 4  ;;  %s359_s0 = smov [#allocation7]   ;;  %s48_s19 = int_to_ptr.vmem [resolvable:$true] %s47_s19 }
   0xa   :  { %53 = dma.hbm_to_vmem [thread:$0]  %s46_s15, 2048, %s48_s19, [#allocation5], %s355_s9, %s355_s9, %s356_s10  }
   0xb   :  { %s62_s20 = sshll.u32 %s359_s0, 4  ;;  %s63_s20 = int_to_ptr.vmem [resolvable:$true] %s62_s20 }
   0xc   :  { %68 = dma.hbm_to_vmem [thread:$0]  %s61_s17, 2048, %s63_s20, [#allocation8], %s355_s9, %s355_s9, %s356_s10  }
   0xd   :  { %348 = dma.done.wait [#allocation3], 128  }
   0xe   :  { %349 = vsyncadd [#allocation3], 4294967168 }
   0xf   :  { %350 = dma.done.wait [#allocation5], 2560  }
  0x10   :  { %351 = vsyncadd [#allocation5], 4294964736 }
  0x11   :  { %352 = dma.done.wait [#allocation8], 2048  }
  0x12   :  { %353 = vsyncadd [#allocation8], 4294965248  ;;  %v91_v0 = vld [vmem:[#allocation4 + $0x18] sm:$0xff]  ;;  %v90_v1 = vld [vmem:[#allocation4 + $0x10] sm:$0xff]  ;;  %vm96_vm0 = vcmask 261120   ;;  %v202_v45 = vlaneseq  ;;  %vm229_vm6 = vcmask 23552  }
  0x13   :  { %112 = vmatpush.msra.mxu0 %v91_v0  ;;  %v136_v2 = vld [vmem:[#allocation6 + $0x78] sm:$0xff]  ;;  %v89_v3 = vld [vmem:[#allocation4 + $0x8] sm:$0xff]  ;;  %v135_v4 = vld [vmem:[#allocation6 + $0x70] sm:$0xff] }
  0x14   :  { %141 = vmatpush.msra.mxu1 %v136_v2  ;;  %v134_v5 = vld [vmem:[#allocation6 + $0x68] sm:$0xff]  ;;  %v88_v6 = vld [vmem:[#allocation4] sm:$0xff]  ;;  %v87_v7 = vld [vmem:[#allocation2] sm:$0xff]  ;;  %v203_v46 = vand.u32 127, %v202_v45 }
  0x15   :  { %113 = vmatpush.msra.mxu0 %v90_v1  ;;  %v133_v8 = vld [vmem:[#allocation6 + $0x60] sm:$0xff]  ;;  %v132_v9 = vld [vmem:[#allocation6 + $0x58] sm:$0xff]  ;;  %v131_v10 = vld [vmem:[#allocation6 + $0x50] sm:$0xff] }
  0x16   :  { %142 = vmatpush.msra.mxu1 %v135_v4  ;;  %v130_v11 = vld [vmem:[#allocation6 + $0x48] sm:$0xff]  ;;  %v129_v12 = vld [vmem:[#allocation6 + $0x40] sm:$0xff]  ;;  %v128_v13 = vld [vmem:[#allocation6 + $0x38] sm:$0xff]  ;;  %vm204_vm1 = vcmp.lt.s32.totalorder %v203_v46, 3 }
  0x17   :  { %114 = vmatpush.msra.mxu0 %v89_v3  ;;  %v127_v14 = vld [vmem:[#allocation6 + $0x30] sm:$0xff]  ;;  %v126_v15 = vld [vmem:[#allocation6 + $0x28] sm:$0xff]  ;;  %v125_v16 = vld [vmem:[#allocation6 + $0x20] sm:$0xff] }
  0x18   :  { %143 = vmatpush.msra.mxu1 %v134_v5  ;;  %v124_v17 = vld [vmem:[#allocation6 + $0x18] sm:$0xff]  ;;  %v123_v18 = vld [vmem:[#allocation6 + $0x10] sm:$0xff]  ;;  %v122_v19 = vld [vmem:[#allocation6 + $0x8] sm:$0xff] }
  0x19   :  { %115 = vmatpush.msra.mxu0 %v88_v6  ;;  %v121_v20 = vld [vmem:[#allocation6] sm:$0xff]  ;;  %v177_v21 = vld [vmem:[#allocation7 + $0x78] sm:$0xff]  ;;  %v176_v22 = vld [vmem:[#allocation7 + $0x70] sm:$0xff] }
  0x1a   :  { %238 = vmatmul.msk.f32.vlgmr.msra.gmra.mxu0 %vm96_vm0, %v87_v7  ;;  %144 = vmatpush.msra.mxu1 %v133_v8  ;;  %v175_v23 = vld [vmem:[#allocation7 + $0x68] sm:$0xff]  ;;  %v174_v24 = vld [vmem:[#allocation7 + $0x60] sm:$0xff]  ;;  %v173_v25 = vld [vmem:[#allocation7 + $0x58] sm:$0xff] }
  0x1b   :  { %182 = vmatpush.msra.mxu2 %v177_v21  ;;  %v172_v26 = vld [vmem:[#allocation7 + $0x50] sm:$0xff]  ;;  %v171_v27 = vld [vmem:[#allocation7 + $0x48] sm:$0xff]  ;;  %v170_v28 = vld [vmem:[#allocation7 + $0x40] sm:$0xff] }
  0x1c   :  { %145 = vmatpush.msra.mxu1 %v132_v9  ;;  %v169_v29 = vld [vmem:[#allocation7 + $0x38] sm:$0xff]  ;;  %v168_v30 = vld [vmem:[#allocation7 + $0x30] sm:$0xff]  ;;  %v167_v31 = vld [vmem:[#allocation7 + $0x28] sm:$0xff] }
  0x1d   :  { %183 = vmatpush.msra.mxu2 %v176_v22  ;;  %v166_v32 = vld [vmem:[#allocation7 + $0x20] sm:$0xff]  ;;  %v165_v33 = vld [vmem:[#allocation7 + $0x18] sm:$0xff]  ;;  %v164_v38 = vld [vmem:[#allocation7 + $0x10] sm:$0xff] }
  0x1e   :  { %146 = vmatpush.msra.mxu1 %v131_v10  ;;  %v245_v34 = vld [vmem:[%s426_s2] ss:$0 sm:$0xff]  ;;  %v163_v39 = vld [vmem:[#allocation7 + $0x8] sm:$0xff]  ;;  %v162_v40 = vld [vmem:[#allocation7] sm:$0xff] }
  0x1f   :  { %184 = vmatpush.msra.mxu2 %v175_v23  ;;  %v246_v41 = vld [vmem:[%s428_s4] ss:$0 sm:$0xff] }
  0x20   :  { %147 = vmatpush.msra.mxu1 %v130_v11  ;;  %v247_v47 = vld [vmem:[%s430_s6] ss:$0 sm:$0xff] }
  0x21   :  { %185 = vmatpush.msra.mxu2 %v174_v24 }
  0x22   :  { %148 = vmatpush.msra.mxu1 %v129_v12 }
  0x23   :  { %186 = vmatpush.msra.mxu2 %v173_v25 }
  0x24   :  { %149 = vmatpush.msra.mxu1 %v128_v13 }
  0x25   :  { %187 = vmatpush.msra.mxu2 %v172_v26 }
  0x26   :  { %150 = vmatpush.msra.mxu1 %v127_v14 }
  0x27   :  { %188 = vmatpush.msra.mxu2 %v171_v27 }
  0x28   :  { %151 = vmatpush.msra.mxu1 %v126_v15 }
  0x29   :  { %189 = vmatpush.msra.mxu2 %v170_v28 }
  0x2a   :  { %152 = vmatpush.msra.mxu1 %v125_v16 }
  0x2b   :  { %190 = vmatpush.msra.mxu2 %v169_v29 }
  0x2c   :  { %153 = vmatpush.msra.mxu1 %v124_v17 }
  0x2d   :  { %191 = vmatpush.msra.mxu2 %v168_v30 }
  0x2e   :  { %154 = vmatpush.msra.mxu1 %v123_v18 }
  0x2f   :  { %192 = vmatpush.msra.mxu2 %v167_v31 }
  0x30   :  { %155 = vmatpush.msra.mxu1 %v122_v19 }
  0x31   :  { %193 = vmatpush.msra.mxu2 %v166_v32 }
  0x32   :  { %156 = vmatpush.msra.mxu1 %v121_v20 }
  0x33   :  { %194 = vmatpush.msra.mxu2 %v165_v33 }
  0x35   :  { %195 = vmatpush.msra.mxu2 %v164_v38 }
  0x37   :  { %196 = vmatpush.msra.mxu2 %v163_v39 }
  0x39   :  { %197 = vmatpush.msra.mxu2 %v162_v40 }
  0x97   :  { %v117_v35 = vpop.f32.mrf.mxu0 }
  0x98   :  { %v118_v36 = vadd.f32 %v245_v34, %v117_v35 }
  0x9a   :  { %v120_v37 = vmax.f32 %v118_v36, 0.0 }
  0x9c   :  { %157 = vmatmul.f32.vlgmr.msra.gmra.mxu1 %v120_v37 }
 0x119   :  { %v158_v42 = vpop.f32.mrf.mxu1 }
 0x11a   :  { %v159_v43 = vadd.f32 %v246_v41, %v158_v42 }
 0x11c   :  { %v161_v44 = vmax.f32 %v159_v43, 0.0 }
 0x11e   :  { %198 = vmatmul.f32.vlgmr.msra.gmra.mxu2 %v161_v44 }
 0x1a1   :  { %v199_v48 = vpop.f32.mrf.mxu2 }
 0x1a2   :  { %v200_v49 = vadd.f32 %v247_v47, %v199_v48 }
 0x1a4   :  { %v205_v50 = vsel %vm204_vm1, %v200_v49, -1e+30 }
 0x1a5   :  { %206 = vmax.xlane.f32.xlu0 %v205_v50 }
 0x218   :  { %v207_v51 = vpop.xlane.xlu0 %206 }
 0x219   :  { %v208_v52 = vsub.f32 %v205_v50, %v207_v51 }
 0x21b   :  { %v209_v53 = vmul.f32 1.442695, %v208_v52 }
 0x21d   :  { %248 = vpow2.f32 %v209_v53 }
 0x223   :  { %v249_v54 = vpop.eup %248 }
 0x224   :  { %v211_v55 = vsel %vm204_vm1, %v249_v54, 0.0 }
 0x225   :  { %212 = vadd.xlane.f32.xlu0 %v211_v55 }
 0x298   :  { %v213_v56 = vpop.xlane.xlu0 %212 }
 0x299   :  { %250 = vrcp.f32 %v213_v56  ;;  %v225_v60 = vand.u32 2147483648, %v213_v56  ;;  %v223_v62 = vand.u32 2147483647, %v213_v56  ;;  %vm219_vm3 = vweird.f32 %v213_v56 }
 0x29b   :  { %v226_v0 = vor.u32 1.1754944e-38, %v225_v60  ;;  %vm224_vm5 = vcmp.eq.f32.partialorder %v223_v62, 8.507059e+37 }
 0x29f   :  { %v251_v57 = vpop.eup %250 }
 0x2a0   :  { %v215_v58 = vmul.f32 %v251_v57, %v213_v56  ;;  %vm220_vm2 = vweird.f32 %v251_v57 }
 0x2a1   :  { %vm221_vm4 = vmor %vm219_vm3, %vm220_vm2 }
 0x2a2   :  { %v216_v59 = vsub.f32 1.0, %v215_v58 }
 0x2a4   :  { %v217_v61 = vmul.f32 %v251_v57, %v216_v59 }
 0x2a6   :  { %v218_v63 = vadd.f32 %v251_v57, %v217_v61 }
 0x2a8   :  { %v222_v1 = vsel %vm221_vm4, %v251_v57, %v218_v63 }
 0x2a9   :  { %v227_v2 = vsel %vm224_vm5, %v226_v0, %v222_v1 }
 0x2aa   :  { %v228_v3 = vmul.f32 %v227_v2, %v211_v55 }
 0x2ac   :  { %230 = vst.msk [vmem:[%s431_s7] sm:$0xff] %vm229_vm6, %v228_v3 }
 0x2ad   :  { %235 = vsyncpa [#allocation3], 1 }
 0x2ae   :  { %236 = vsyncpa [#allocation5], 1 }
 0x2af   :  { %237 = vsyncpa [#allocation8], 1 }

</bundles_post_ra>
